<compile_context>
chip_gen: v7x
topology: tpu7x:2x2x1
jax: 0.10.0
libtpu: 0.0.40
codegen_flags: <defaults>
</compile_context>

<pallas_src>
import functools
import math

import numpy as np
import jax
import jax.numpy as jnp
from jax.experimental import pallas as pl
from jax.experimental.pallas import tpu as pltpu


def make_haar_weights(channel_in):
    """Mirrors the torch module __init__ exactly: shape (4*channel_in, 1, 2, 2)."""
    w = np.ones((4, 1, 2, 2), dtype=np.float32)
    w[1, 0, 0, 1] = -1
    w[1, 0, 1, 1] = -1
    w[2, 0, 1, 0] = -1
    w[2, 0, 1, 1] = -1
    w[3, 0, 1, 0] = -1
    w[3, 0, 0, 1] = -1
    w = np.concatenate([w] * channel_in, axis=0)
    return jnp.asarray(w)


def _build_projection(W):
    """Fused Haar pair-selection matrix (W, W), values in {0, +/-0.25} (exact in bf16).

    With S = even_row + odd_row and D = even_row - odd_row (a/b resp. c/d still
    interleaved along lanes):
        cols [0 :Wh]  (P_plus ): S -> (a+b+c+d)/4 = k0,  D -> (a+b-c-d)/4 = k2
        cols [Wh:W ]  (P_minus): S -> (a-b+c-d)/4 = k1,  D -> (a-b-c+d)/4 = k3
    The /4 of the torch conv is folded into the +/-0.25 entries.
    """
    Wh = W // 2
    cols = np.arange(Wh)
    p = np.zeros((W, W), np.float32)
    p[2 * cols, cols] = 0.25
    p[2 * cols + 1, cols] = 0.25
    p[2 * cols, Wh + cols] = 0.25
    p[2 * cols + 1, Wh + cols] = -0.25
    return p


def _vmem_limit_bytes():
    """Explicit scoped-VMEM limit: ~75% of physical (v5e/v6e 128 MiB, v7x 64 MiB)."""
    try:
        cap = int(pltpu.get_tpu_info().vmem_capacity_bytes)
    except Exception:
        cap = 64 << 20
    return max(32 << 20, min(cap * 3 // 4, 100 << 20))


_VMEM_TILE_BUDGET = 40 << 20        # conservative: fits under the v7x limit with headroom
_TARGET_TILE_ELEMS = 512 * 1024     # TR*W ~ 0.5M elems/step -> near HBM roofline, low step overhead


def _pick_row_tile(R, W, itemsize, B):
    """Row tile TR (multiple of 8); the cdiv grid pads the last block, so no divisor search."""
    # Per-row VMEM bytes: double-buffered input (2W wide) + output (4*Wh = 2W wide)
    # + f32/bf16 in-kernel temporaries (lhs, bf16 splits, accumulator).
    per_row = 8 * W * itemsize + 32 * W
    budget = max(_VMEM_TILE_BUDGET - 4 * W * W, 8 << 20)   # minus double-buffered bf16 projection
    tr = min(R, budget // per_row, max(_TARGET_TILE_ELEMS // W, 8))
    tr = max(8, (tr // 8) * 8)
    # v7x has 2 TensorCores per chip: with B == 1 keep >= 2 steps on the row axis so both get work.
    if B == 1 and R > 8 and pl.cdiv(R, tr) < 2:
        tr = max(8, ((R // 2) // 8) * 8)
    return tr


def _haar_kernel(x_ref, p_ref, o_ref, *, split_f32):
    # x_ref: VMEM (1, TR, 2W)    row r = [x[c, 2i, :] | x[c, 2i+1, :]],  r = c*Hh + i
    # p_ref: VMEM (W, W) bf16    fused [P_plus | P_minus] pair-selection (+/-0.25)
    # o_ref: VMEM (1, 4, TR, Wh) axis 1 = Haar filter index k
    TR = x_ref.shape[1]
    W = x_ref.shape[2] // 2
    Wh = W // 2

    x = x_ref[0]
    xe = x[:, :W].astype(jnp.float32)        # even input rows (a|b interleaved along lanes)
    xo = x[:, W:].astype(jnp.float32)        # odd  input rows (c|d interleaved along lanes)
    # One fused MXU operand: rows [0:TR] = sum, rows [TR:2TR] = diff; N = W keeps the MXU full.
    lhs = jnp.concatenate([xe + xo, xe - xo], axis=0)          # (2TR, W) f32
    rhs = p_ref[...]                                           # (W, W) bf16, exact constants

    # f32 inputs: 3-pass bf16 emulation (== Precision.HIGH, half of HIGHEST's passes).
    # The RHS is exact in bf16, so splitting only the LHS reproduces f32-level accuracy.
    hi = lhs.astype(jnp.bfloat16)
    y = jnp.dot(hi, rhs, preferred_element_type=jnp.float32)
    if split_f32:
        r1 = lhs - hi.astype(jnp.float32)
        mid = r1.astype(jnp.bfloat16)
        lo = (r1 - mid.astype(jnp.float32)).astype(jnp.bfloat16)
        y = y + jnp.dot(mid, rhs, preferred_element_type=jnp.float32)
        y = y + jnp.dot(lo, rhs, preferred_element_type=jnp.float32)

    odt = o_ref.dtype
    o_ref[0, 0] = y[:TR, :Wh].astype(odt)    # (a+b+c+d)/4
    o_ref[0, 1] = y[:TR, Wh:].astype(odt)    # (a-b+c-d)/4
    o_ref[0, 2] = y[TR:, :Wh].astype(odt)    # (a+b-c-d)/4
    o_ref[0, 3] = y[TR:, Wh:].astype(odt)    # (a-b-c+d)/4


def haar_downsampling(x):
    """Equivalent to HaarDownsampling(channel_in=C).forward(x, rev=False)."""
    B, C, H, W = x.shape
    assert H % 2 == 0 and W % 2 == 0, "HaarDownsampling requires even spatial dims"
    Hh, Wh = H // 2, W // 2
    R = C * Hh

    # bookkeeping only (torch stores this for .jacobian(); not part of the forward output)
    _last_jac = (C * H * W) / 4 * math.log(1 / 16.0)  # noqa: F841

    x2 = x.reshape(B, R, 2 * W)                                     # copy-free row-pair view
    proj = jnp.asarray(_build_projection(W), dtype=jnp.bfloat16)    # constant, exact in bf16

    TR = _pick_row_tile(R, W, x.dtype.itemsize, B)
    grid = (B, pl.cdiv(R, TR))
    kernel = functools.partial(_haar_kernel, split_f32=(x.dtype == jnp.float32))

    out4 = pl.pallas_call(
        kernel,
        out_shape=jax.ShapeDtypeStruct((B, 4, R, Wh), x.dtype),
        grid=grid,
        in_specs=[
            pl.BlockSpec((1, TR, 2 * W), lambda b, t: (b, t, 0)),
            # constant block index -> fetched once, stays resident across the grid
            pl.BlockSpec((W, W), lambda b, t: (0, 0)),
        ],
        out_specs=pl.BlockSpec((1, 4, TR, Wh), lambda b, t: (b, 0, t, 0)),
        compiler_params=pltpu.CompilerParams(
            dimension_semantics=("parallel", "parallel"),
            vmem_limit_bytes=_vmem_limit_bytes(),
        ),
    )(x2, proj)

    # copy-free view: (B, 4, C*Hh, Wh) -> (B, 4*C, Hh, Wh); channel = k*C + c (torch order)
    return out4.reshape(B, 4 * C, Hh, Wh)


def haar_ref(x, haar_weights):
    """Pure-JAX reference matching the torch grouped-conv + reshape/transpose."""
    B, C, H, W = x.shape
    a = x[:, :, 0::2, 0::2]
    b = x[:, :, 0::2, 1::2]
    c = x[:, :, 1::2, 0::2]
    d = x[:, :, 1::2, 1::2]
    outs = []
    for k in range(4):
        wk = haar_weights[k, 0]
        outs.append((wk[0, 0] * a + wk[0, 1] * b + wk[1, 0] * c + wk[1, 1] * d) / 4.0)
    out = jnp.stack(outs, axis=1)            # (B, 4, C, H//2, W//2)
    return out.reshape(B, 4 * C, H // 2, W // 2)


if __name__ == "__main__":
    B, C, H, W = 2, 4, 16, 16
    key = jax.random.PRNGKey(0)
    x = jax.random.normal(key, (B, C, H, W), dtype=jnp.float32)

    haar_fn = jax.jit(haar_downsampling)
    out = jax.block_until_ready(haar_fn(x))

    haar_weights = make_haar_weights(C)       # (4*C, 1, 2, 2), deterministic
    ref = haar_ref(x, haar_weights)

    assert out.shape == (B, 4 * C, H // 2, W // 2), out.shape
    np.testing.assert_allclose(np.asarray(out), np.asarray(ref),
                               rtol=1e-5, atol=1e-5)
    print("KERNEL_OK")
</pallas_src>

<mosaic_0001>
module attributes {stable_mosaic.version = 11 : i64} {
  func.func @_haar_kernel(%arg0: i32, %arg1: i32, %arg2: memref<1x32x32xf32, #tpu.memory_space<vmem>>, %arg3: memref<16x16xbf16, #tpu.memory_space<vmem>>, %arg4: memref<1x4x32x8xf32, #tpu.memory_space<vmem>>) attributes {dimension_semantics = [#tpu.dimension_semantics<parallel>, #tpu.dimension_semantics<parallel>], iteration_bounds = array<i64: 2, 1>, scalar_prefetch = 0 : i64, scratch_operands = 0 : i64, tpu.core_type = #tpu.core_type<tc>, window_params = [{transform_indices = @transform_0, window_bounds = array<i64: 1, 32, 32>}, {pipeline_mode = #tpu.pipeline_mode<synchronous>, transform_indices = @transform_1, window_bounds = array<i64: 16, 16>}, {transform_indices = @transform_2, window_bounds = array<i64: 1, 4, 32, 8>}]} {
    %c0 = arith.constant 0 : index
    %c0_0 = arith.constant 0 : index
    %c0_1 = arith.constant 0 : index
    %0 = vector.load %arg2[%c0, %c0_0, %c0_1] : memref<1x32x32xf32, #tpu.memory_space<vmem>>, vector<1x32x32xf32>
    %1 = vector.shape_cast %0 : vector<1x32x32xf32> to vector<32x32xf32>
    %2 = vector.extract_strided_slice %1 {offsets = [0, 0], sizes = [32, 16], strides = [1, 1]} : vector<32x32xf32> to vector<32x16xf32>
    %3 = vector.extract_strided_slice %1 {offsets = [0, 16], sizes = [32, 16], strides = [1, 1]} : vector<32x32xf32> to vector<32x16xf32>
    %4 = arith.addf %2, %3 : vector<32x16xf32>
    %5 = arith.subf %2, %3 : vector<32x16xf32>
    %6 = tpu.concatenate %4, %5 in 0 : vector<32x16xf32>, vector<32x16xf32> -> vector<64x16xf32>
    %c0_2 = arith.constant 0 : index
    %c0_3 = arith.constant 0 : index
    %7 = vector.load %arg3[%c0_2, %c0_3] : memref<16x16xbf16, #tpu.memory_space<vmem>>, vector<16x16xbf16>
    %8 = arith.truncf %6 : vector<64x16xf32> to vector<64x16xbf16>
    %cst = arith.constant dense<0.000000e+00> : vector<64x16xf32>
    %9 = tpu.matmul %8, %7, %cst {dimension_numbers = #tpu.dot_dimension_numbers<[1], [0], [0], [1], [0, 0, 1, 1], [], []>} : vector<64x16xbf16>, vector<16x16xbf16>, vector<64x16xf32> -> vector<64x16xf32>
    %10 = arith.extf %8 : vector<64x16xbf16> to vector<64x16xf32>
    %11 = arith.subf %6, %10 : vector<64x16xf32>
    %12 = arith.truncf %11 : vector<64x16xf32> to vector<64x16xbf16>
    %13 = arith.extf %12 : vector<64x16xbf16> to vector<64x16xf32>
    %14 = arith.subf %11, %13 : vector<64x16xf32>
    %15 = arith.truncf %14 : vector<64x16xf32> to vector<64x16xbf16>
    %cst_4 = arith.constant dense<0.000000e+00> : vector<64x16xf32>
    %16 = tpu.matmul %12, %7, %cst_4 {dimension_numbers = #tpu.dot_dimension_numbers<[1], [0], [0], [1], [0, 0, 1, 1], [], []>} : vector<64x16xbf16>, vector<16x16xbf16>, vector<64x16xf32> -> vector<64x16xf32>
    %17 = arith.addf %9, %16 : vector<64x16xf32>
    %cst_5 = arith.constant dense<0.000000e+00> : vector<64x16xf32>
    %18 = tpu.matmul %15, %7, %cst_5 {dimension_numbers = #tpu.dot_dimension_numbers<[1], [0], [0], [1], [0, 0, 1, 1], [], []>} : vector<64x16xbf16>, vector<16x16xbf16>, vector<64x16xf32> -> vector<64x16xf32>
    %19 = arith.addf %17, %18 : vector<64x16xf32>
    %20 = vector.extract_strided_slice %19 {offsets = [0, 0], sizes = [32, 8], strides = [1, 1]} : vector<64x16xf32> to vector<32x8xf32>
    %c0_6 = arith.constant 0 : index
    %c0_7 = arith.constant 0 : index
    %c0_8 = arith.constant 0 : index
    %c0_9 = arith.constant 0 : index
    %21 = vector.load %arg4[%c0_6, %c0_7, %c0_8, %c0_9] : memref<1x4x32x8xf32, #tpu.memory_space<vmem>>, vector<1x1x32x8xf32>
    %22 = vector.shape_cast %21 : vector<1x1x32x8xf32> to vector<32x8xf32>
    %23 = vector.shape_cast %20 : vector<32x8xf32> to vector<1x1x32x8xf32>
    tpu.vector_store %arg4[%c0_6, %c0_7, %c0_8, %c0_9], %23 {strides = array<i32>} : memref<1x4x32x8xf32, #tpu.memory_space<vmem>>, vector<1x1x32x8xf32>,
    %24 = vector.extract_strided_slice %19 {offsets = [0, 8], sizes = [32, 8], strides = [1, 1]} : vector<64x16xf32> to vector<32x8xf32>
    %c0_10 = arith.constant 0 : index
    %c1 = arith.constant 1 : index
    %c0_11 = arith.constant 0 : index
    %c0_12 = arith.constant 0 : index
    %25 = vector.load %arg4[%c0_10, %c1, %c0_11, %c0_12] : memref<1x4x32x8xf32, #tpu.memory_space<vmem>>, vector<1x1x32x8xf32>
    %26 = vector.shape_cast %25 : vector<1x1x32x8xf32> to vector<32x8xf32>
    %27 = vector.shape_cast %24 : vector<32x8xf32> to vector<1x1x32x8xf32>
    tpu.vector_store %arg4[%c0_10, %c1, %c0_11, %c0_12], %27 {strides = array<i32>} : memref<1x4x32x8xf32, #tpu.memory_space<vmem>>, vector<1x1x32x8xf32>,
    %28 = vector.extract_strided_slice %19 {offsets = [32, 0], sizes = [32, 8], strides = [1, 1]} : vector<64x16xf32> to vector<32x8xf32>
    %c0_13 = arith.constant 0 : index
    %c2 = arith.constant 2 : index
    %c0_14 = arith.constant 0 : index
    %c0_15 = arith.constant 0 : index
    %29 = vector.load %arg4[%c0_13, %c2, %c0_14, %c0_15] : memref<1x4x32x8xf32, #tpu.memory_space<vmem>>, vector<1x1x32x8xf32>
    %30 = vector.shape_cast %29 : vector<1x1x32x8xf32> to vector<32x8xf32>
    %31 = vector.shape_cast %28 : vector<32x8xf32> to vector<1x1x32x8xf32>
    tpu.vector_store %arg4[%c0_13, %c2, %c0_14, %c0_15], %31 {strides = array<i32>} : memref<1x4x32x8xf32, #tpu.memory_space<vmem>>, vector<1x1x32x8xf32>,
    %32 = vector.extract_strided_slice %19 {offsets = [32, 8], sizes = [32, 8], strides = [1, 1]} : vector<64x16xf32> to vector<32x8xf32>
    %c0_16 = arith.constant 0 : index
    %c3 = arith.constant 3 : index
    %c0_17 = arith.constant 0 : index
    %c0_18 = arith.constant 0 : index
    %33 = vector.load %arg4[%c0_16, %c3, %c0_17, %c0_18] : memref<1x4x32x8xf32, #tpu.memory_space<vmem>>, vector<1x1x32x8xf32>
    %34 = vector.shape_cast %33 : vector<1x1x32x8xf32> to vector<32x8xf32>
    %35 = vector.shape_cast %32 : vector<32x8xf32> to vector<1x1x32x8xf32>
    tpu.vector_store %arg4[%c0_16, %c3, %c0_17, %c0_18], %35 {strides = array<i32>} : memref<1x4x32x8xf32, #tpu.memory_space<vmem>>, vector<1x1x32x8xf32>,
    return
  }
  func.func @transform_0(%arg0: i32, %arg1: i32) -> (i32, i32, i32) {
    %c0_i32 = arith.constant 0 : i32
    %c0_i32_0 = arith.constant 0 : i32
    return %arg0, %arg1, %c0_i32 : i32, i32, i32
  }
  func.func @transform_1(%arg0: i32, %arg1: i32) -> (i32, i32) {
    %c0_i32 = arith.constant 0 : i32
    %c0_i32_0 = arith.constant 0 : i32
    %c0_i32_1 = arith.constant 0 : i32
    return %c0_i32, %c0_i32_0 : i32, i32
  }
  func.func @transform_2(%arg0: i32, %arg1: i32) -> (i32, i32, i32, i32) {
    %c0_i32 = arith.constant 0 : i32
    %c0_i32_0 = arith.constant 0 : i32
    %c0_i32_1 = arith.constant 0 : i32
    return %arg0, %c0_i32, %arg1, %c0_i32_0 : i32, i32, i32, i32
  }
}

</mosaic_0001>

<bundles_post_ra>
// kernel: haar_downsampling.1
= control target key start
LH: loop header
LB: loop body
LE: loop exit
PB: predicated region body
PF: predicated region fallthrough
CT: control target
= control target key end

     0   :  { %s812_s9 = smov 0   ;;  %s814_s10 = smov 0   ;;  %s908_s0 = inlined_call_operand.vmem [shape: f32[2,32,32], index: 0, kind: input, shape index: {}]   ;;  %s909_s1 = inlined_call_operand.vmem [shape: bf16[16,16], index: 1, kind: input, shape index: {}]   ;;  %s910_s2 = inlined_call_operand.vmem [shape: f32[2,4,32,8], index: 2, kind: output, shape index: {}]  }
   0x1   :  { %s816_s11 = smov 0  }
   0x2 LB: > { %s24_s12 = sadd.s32 1, %s789_s10  ;;  %p647_p0 = scmp.ge.s32.totalorder %s793_s11, 1  ;;  %s793_s11 = sphi %s816_s11, %s12_s11   ;;  %s789_s10 = sphi %s814_s10, %s912_s10   ;;  %s785_s9 = sphi %s812_s9, %s911_s9  }
   0x3   : > { %p26_p1 = scmp.ge.s32.totalorder %s24_s12, 2  ;;  %p133_p2 = scmp.lt.s32.totalorder %s793_s11, 3 }
   0x5   : > { %s914_s12 = smov (%p26_p1, %s24_s12), 0  ;;  %p134_p3 = pnand %p647_p0, %p133_p2 }
   0x6   : > { %p164_p4 = scmp.lt.s32.totalorder (!%p134_p3), %s785_s9, 1  ;;  %v833_v0 = vld [vmem:[%s909_s1] sm:$0xff] (!%p134_p3)   ;;  %s795_s19 = smov (!%p134_p3), 112   ;;  %vm264_vm0 = vcmask (!%p134_p3), 130048   ;;  %vm504_vm1 = vcmask (!%p134_p3), 64512  }
   0x7   : > { %137 = sbr.rel (%p134_p3) target bundleno = 506 (0x1fa), region = 28  ;;  %706 = vmatprep.subr.bf16.mxu0 (!%p134_p3), %v833_v0  ;;  %696 = vmatprep.subr.bf16.mxu1 (!%p134_p3), %v833_v0  ;;  %s796_s24 = smov (!%p134_p3), 120  }
   0x8   : > { %707 = vmatpush3.bf16.msra.mxu0 (!%p134_p3), %v833_v0  ;;  %697 = vmatpush3.bf16.msra.mxu1 (!%p134_p3), %v833_v0 }
   0x9   : > { %726 = vmatprep.subr.bf16.mxu1 (!%p134_p3), %v833_v0  ;;  %716 = vmatprep.subr.bf16.mxu0 (!%p134_p3), %v833_v0 }
   0xe   : > { %s916_s9 = smov (!%p164_p4, %s785_s9), 1 }
   0xf   : > { %s679_s15 = sshll.u32 %s916_s9, 5  ;;  %s680_s20 = sshll.u32 %s916_s9, 7 }
  0x10   : > { %s171_s18 = scalar_lea.vmem %s908_s0, %s679_s15  ;;  %s865_s23 = scalar_lea.vmem %s910_s2, %s680_s20 }
  0x11   : > { %v186_v1 = vld [vmem:[%s171_s18 + $0x10] sm:$0xff]  ;;  %v184_v2 = vld [vmem:[%s171_s18] sm:$0xff]  ;;  %v187_v3 = vld [vmem:[%s171_s18 + $0x18] sm:$0xff] }
  0x12   : > { %196 = vrot.lane.b32.xlu1 %v186_v1, %s795_s19  ;;  %192 = vrot.lane.b32.xlu0 %v184_v2, %s795_s19  ;;  %v185_v4 = vld [vmem:[%s171_s18 + $0x8] sm:$0xff] }
  0x16   : > { %198 = vrot.lane.b32.xlu1 %v187_v3, %s795_s19  ;;  %194 = vrot.lane.b32.xlu0 %v185_v4, %s795_s19 }
  0x84   : > { %v197_v5 = vpop.permute.xlu1 %196  ;;  %v193_v6 = vpop.permute.xlu0 %192 }
  0x85   : > { %v206_v7 = vadd.f32 %v197_v5, %v186_v1  ;;  %v210_v8 = vsub.f32 %v186_v1, %v197_v5  ;;  %v204_v9 = vadd.f32 %v193_v6, %v184_v2  ;;  %v208_v10 = vsub.f32 %v184_v2, %v193_v6 }
  0x88   : > { %v199_v11 = vpop.permute.xlu1 %198  ;;  %v195_v12 = vpop.permute.xlu0 %194 }
  0x89   : > { %v207_v13 = vadd.f32 %v199_v11, %v187_v3  ;;  %v211_v14 = vsub.f32 %v187_v3, %v199_v11  ;;  %v205_v15 = vadd.f32 %v195_v12, %v185_v4  ;;  %v209_v16 = vsub.f32 %v185_v4, %v195_v12 }
  0x8b   : > { %v215_v17 = vpack.c.bf16 %v207_v13, %v206_v7  ;;  %v217_v18 = vpack.c.bf16 %v211_v14, %v210_v8  ;;  %v214_v19 = vpack.c.bf16 %v205_v15, %v204_v9  ;;  %v216_v20 = vpack.c.bf16 %v209_v16, %v208_v10 }
  0x8d   : > { %v220_v21 = vunpack.c.l.bf16 %v215_v17  ;;  %v221_v22 = vunpack.c.h.bf16 %v215_v17  ;;  %v224_v23 = vunpack.c.l.bf16 %v217_v18  ;;  %v225_v24 = vunpack.c.h.bf16 %v217_v18  ;;  %708 = vmatprep.mubr.msk.bf16.mxu0 %vm264_vm0, %v214_v19 }
  0x8e   : > { %v219_v25 = vunpack.c.h.bf16 %v214_v19  ;;  %v222_v26 = vunpack.c.l.bf16 %v216_v20  ;;  %v223_v27 = vunpack.c.h.bf16 %v216_v20  ;;  %709 = vmatmul.mubr.msk.bf16.vlgmr.msra.gmra.mrb[0].mxu0 %vm264_vm0, %v215_v17  ;;  %v218_v28 = vunpack.c.l.bf16 %v214_v19 }
  0x8f   : > { %v228_v29 = vsub.f32 %v206_v7, %v220_v21  ;;  %v229_v30 = vsub.f32 %v207_v13, %v221_v22  ;;  %717 = vmatpush3.bf16.msra.mxu0 %v833_v0  ;;  %v232_v35 = vsub.f32 %v210_v8, %v224_v23  ;;  %v233_v36 = vsub.f32 %v211_v14, %v225_v24 }
  0x90   : > { %v227_v31 = vsub.f32 %v205_v15, %v219_v25  ;;  %v230_v32 = vsub.f32 %v208_v10, %v222_v26  ;;  %v231_v33 = vsub.f32 %v209_v16, %v223_v27  ;;  %v226_v34 = vsub.f32 %v204_v9, %v218_v28 }
  0x91   : > { %v235_v37 = vpack.c.bf16 %v229_v30, %v228_v29  ;;  %v237_v46 = vpack.c.bf16 %v233_v36, %v232_v35 }
  0x92   : > { %v236_v38 = vpack.c.bf16 %v231_v33, %v230_v32  ;;  %v234_v39 = vpack.c.bf16 %v227_v31, %v226_v34 }
  0x93   : > { %v240_v40 = vunpack.c.l.bf16 %v235_v37  ;;  %v241_v41 = vunpack.c.h.bf16 %v235_v37  ;;  %v244_v55 = vunpack.c.l.bf16 %v237_v46  ;;  %v245_v56 = vunpack.c.h.bf16 %v237_v46 }
  0x94   : > { %v242_v42 = vunpack.c.l.bf16 %v236_v38  ;;  %v243_v43 = vunpack.c.h.bf16 %v236_v38  ;;  %v238_v44 = vunpack.c.l.bf16 %v234_v39  ;;  %v239_v45 = vunpack.c.h.bf16 %v234_v39  ;;  %698 = vmatprep.mubr.msk.bf16.mxu1 %vm264_vm0, %v234_v39 }
  0x95   : > { %v248_v47 = vsub.f32 %v228_v29, %v240_v40  ;;  %v249_v48 = vsub.f32 %v229_v30, %v241_v41  ;;  %699 = vmatmul.mubr.msk.bf16.vlgmr.msra.gmra.mrb[0].mxu1 %vm264_vm0, %v235_v37  ;;  %v253_v58 = vsub.f32 %v233_v36, %v245_v56  ;;  %v252_v59 = vsub.f32 %v232_v35, %v244_v55 }
  0x96   : > { %v251_v49 = vsub.f32 %v231_v33, %v243_v43  ;;  %v246_v50 = vsub.f32 %v226_v34, %v238_v44  ;;  %727 = vmatpush3.bf16.msra.mxu1 %v833_v0  ;;  %702 = vmatprep.mubr.msk.bf16.mxu1 %vm264_vm0, %v236_v38  ;;  %v247_v51 = vsub.f32 %v227_v31, %v239_v45 }
  0x97   : > { %v255_v52 = vpack.c.bf16 %v249_v48, %v248_v47  ;;  %v250_v53 = vsub.f32 %v230_v32, %v242_v42  ;;  %v257_v60 = vpack.c.bf16 %v253_v58, %v252_v59 }
  0x98   : > { %v254_v54 = vpack.c.bf16 %v247_v51, %v246_v50 }
  0x99   : > { %v256_v57 = vpack.c.bf16 %v251_v49, %v250_v53 }
  0x9a   : > { %718 = vmatprep.mubr.msk.bf16.mxu0 %vm264_vm0, %v254_v54 }
  0x9b   : > { %719 = vmatmul.mubr.msk.bf16.vlgmr.msra.gmra.mrb[0].mxu0 %vm264_vm0, %v255_v52 }
  0x9c   : > { %722 = vmatprep.mubr.msk.bf16.mxu0 %vm264_vm0, %v256_v57 }
  0x9d   : > { %703 = vmatmul.mubr.msk.bf16.gmra.mrb[4].mxu1 %vm264_vm0, %v237_v46 }
  0x9e   : > { %712 = vmatprep.mubr.msk.bf16.mxu1 %vm264_vm0, %v216_v20 }
  0xa3   : > { %723 = vmatmul.mubr.msk.bf16.gmra.mrb[4].mxu0 %vm264_vm0, %v257_v60 }
  0xa9   : > { %713 = vmatmul.mubr.msk.bf16.vlgmr.msra.gmra.mrb[4].mxu1 %vm264_vm0, %v217_v18 }
 0x168   : > { %v700_v61 = vpop.f32.mrb[0].mxu1 }
 0x169   : > { %v311_v62 = vpop.f32.mrb[1].mxu1 }
 0x16a   : > { %v701_v63 = vpop.f32.mrb[2].mxu1 }
 0x16b   : > { %v314_v0 = vpop.f32.mrb[3].mxu1 }
 0x16e   : > { %v720_v1 = vpop.f32.mrb[0].mxu0 }
 0x16f   : > { %v728_v2 = vadd.f32 %v720_v1, %v700_v61  ;;  %v465_v3 = vpop.f32.mrb[1].mxu0 }
 0x170   : > { %v729_v4 = vadd.f32 %v465_v3, %v311_v62  ;;  %v721_v5 = vpop.f32.mrb[2].mxu0 }
 0x171   : > { %507 = vst.msk [vmem:[%s865_s23 + $0x10] sm:$0xff] %vm504_vm1, %v728_v2  ;;  %v730_v6 = vadd.f32 %v721_v5, %v701_v63  ;;  %517 = vrot.lane.b32.xlu0 %v728_v2, %s796_s24  ;;  %v468_v7 = vpop.f32.mrb[3].mxu0 }
 0x172   : > { %505 = vst.msk [vmem:[%s865_s23] sm:$0xff] %vm504_vm1, %v729_v4  ;;  %v731_v8 = vadd.f32 %v468_v7, %v314_v0 }
 0x173   : > { %508 = vst.msk [vmem:[%s865_s23 + $0x18] sm:$0xff] %vm504_vm1, %v730_v6  ;;  %519 = vrot.lane.b32.xlu1 %v730_v6, %s796_s24 }
 0x174   : > { %506 = vst.msk [vmem:[%s865_s23 + $0x8] sm:$0xff] %vm504_vm1, %v731_v8 }
 0x175   : > { %513 = vrot.lane.b32.xlu0 %v729_v4, %s796_s24 }
 0x176   : > { %v724_v9 = vpop.f32.mrb[4].mxu0 }
 0x177   : > { %515 = vrot.lane.b32.xlu1 %v731_v8, %s796_s24  ;;  %v481_v10 = vpop.f32.mrb[5].mxu0 }
 0x178   : > { %v725_v11 = vpop.f32.mrb[6].mxu0 }
 0x179   : > { %v484_v12 = vpop.f32.mrb[7].mxu0 }
 0x17c   : > { %v714_v13 = vpop.f32.mrb[4].mxu1 }
 0x17d   : > { %v732_v14 = vadd.f32 %v724_v9, %v714_v13  ;;  %v404_v15 = vpop.f32.mrb[5].mxu1 }
 0x17e   : > { %v733_v16 = vadd.f32 %v481_v10, %v404_v15  ;;  %v715_v17 = vpop.f32.mrb[6].mxu1 }
 0x17f   : > { %671 = vst.msk [vmem:[%s865_s23 + $0x50] sm:$0xff] %vm504_vm1, %v732_v14  ;;  %v734_v18 = vadd.f32 %v725_v11, %v715_v17  ;;  %v407_v19 = vpop.f32.mrb[7].mxu1 }
 0x180   : > { %669 = vst.msk [vmem:[%s865_s23 + $0x40] sm:$0xff] %vm504_vm1, %v733_v16  ;;  %v735_v20 = vadd.f32 %v484_v12, %v407_v19  ;;  %539 = vrot.lane.b32.xlu0 %v733_v16, %s796_s24 }
 0x181   : > { %672 = vst.msk [vmem:[%s865_s23 + $0x58] sm:$0xff] %vm504_vm1, %v734_v18 }
 0x182   : > { %670 = vst.msk [vmem:[%s865_s23 + $0x48] sm:$0xff] %vm504_vm1, %v735_v20  ;;  %541 = vrot.lane.b32.xlu1 %v735_v20, %s796_s24 }
 0x184   : > { %543 = vrot.lane.b32.xlu0 %v732_v14, %s796_s24 }
 0x186   : > { %545 = vrot.lane.b32.xlu1 %v734_v18, %s796_s24 }
 0x1e3   : > { %v518_v21 = vpop.permute.xlu0 %517 }
 0x1e4   : > { %667 = vst.msk [vmem:[%s865_s23 + $0x30] sm:$0xff] %vm504_vm1, %v518_v21 }
 0x1e5   : > { %v520_v22 = vpop.permute.xlu1 %519 }
 0x1e6   : > { %668 = vst.msk [vmem:[%s865_s23 + $0x38] sm:$0xff] %vm504_vm1, %v520_v22 }
 0x1e7   : > { %v514_v23 = vpop.permute.xlu0 %513 }
 0x1e8   : > { %665 = vst.msk [vmem:[%s865_s23 + $0x20] sm:$0xff] %vm504_vm1, %v514_v23 }
 0x1e9   : > { %v516_v24 = vpop.permute.xlu1 %515 }
 0x1ea   : > { %666 = vst.msk [vmem:[%s865_s23 + $0x28] sm:$0xff] %vm504_vm1, %v516_v24 }
 0x1f2   : > { %v540_v25 = vpop.permute.xlu0 %539 }
 0x1f3   : > { %673 = vst.msk [vmem:[%s865_s23 + $0x60] sm:$0xff] %vm504_vm1, %v540_v25 }
 0x1f4   : > { %v542_v26 = vpop.permute.xlu1 %541 }
 0x1f5   : > { %674 = vst.msk [vmem:[%s865_s23 + $0x68] sm:$0xff] %vm504_vm1, %v542_v26 }
 0x1f6   : > { %v544_v27 = vpop.permute.xlu0 %543 }
 0x1f7   : > { %675 = vst.msk [vmem:[%s865_s23 + $0x70] sm:$0xff] %vm504_vm1, %v544_v27 }
 0x1f8   : > { %v546_v28 = vpop.permute.xlu1 %545 }
 0x1f9   : > { %676 = vst.msk [vmem:[%s865_s23 + $0x78] sm:$0xff] %vm504_vm1, %v546_v28 }
 0x1fa PF: > { %s12_s11 = sadd.s32 1, %s793_s11   ;;  %s911_s9 = smov %s789_s10 }
 0x1fb   : > { %p9_p5 = scmp.ge.s32.totalorder %s12_s11, 4   ;;  %s912_s10 = smov %s914_s12 }
 0x1fd   :  { %11 = sbr.rel (!%p9_p5) target bundleno = 2 (0x2), region = 61 }

</bundles_post_ra>
